<compile_context>
chip_gen: v6e
topology: v6e:2x2x1
jax: 0.10.0
libtpu: 0.0.40
codegen_flags: <defaults>
</compile_context>

<pallas_src>
import functools

import jax
import jax.numpy as jnp
import numpy as np
from jax import lax
from jax.experimental import pallas as pl
from jax.experimental.pallas import tpu as pltpu


# ----------------------------------------------------------------------------
# Schedule construction (plain numpy "glue" -- mirrors diffusion_utils.*)
# ----------------------------------------------------------------------------
def cosine_beta_schedule_discrete(timesteps: int, s: float = 0.008) -> np.ndarray:
    """Cosine schedule (Nichol & Dhariwal), discrete-beta form used by DiGress."""
    steps = timesteps + 2
    x = np.linspace(0, steps, steps)
    alphas_cumprod = np.cos(0.5 * np.pi * ((x / steps) + s) / (1 + s)) ** 2
    alphas_cumprod = alphas_cumprod / alphas_cumprod[0]
    alphas = alphas_cumprod[1:] / alphas_cumprod[:-1]
    betas = 1.0 - alphas
    return betas.squeeze().astype(np.float64)  # length = timesteps + 1


# ----------------------------------------------------------------------------
# Pallas kernels: clamped index + table gather via sublane one-hot reduce.
# Layouts (lane-dense):
#   t_ref:     (1, L)   -- batch on the lane axis
#   table_ref: (Np, 1)  -- table on the sublane axis (Np multiple of 8)
#   out_ref:   (1, L)   -- lane-dense output (unmasked stores)
# ----------------------------------------------------------------------------
def _lookup_body(idx, table_ref, out_ref):
    n = table_ref.shape[0]
    l = idx.shape[1]
    sub_iota = lax.broadcasted_iota(jnp.int32, (n, l), 0)          # (Np, L)
    # Single select (no bool->f32 cast, no mul); sublane reduce on XLU/VPU.
    sel = jnp.where(sub_iota == idx, table_ref[...], jnp.float32(0.0))
    out_ref[...] = jnp.sum(sel, axis=0, keepdims=True)             # (1, L)


def _gather_kernel_float(t_ref, table_ref, out_ref, *, scale: float, max_idx: int):
    t = t_ref[...]                                                  # (1, L) f32
    # torch.round is round-half-to-even; jnp.round matches.
    idx = jnp.round(t * jnp.float32(scale)).astype(jnp.int32)
    idx = jnp.clip(idx, 0, max_idx)          # never select zero-padded rows
    _lookup_body(idx, table_ref, out_ref)


def _gather_kernel_int(t_ref, table_ref, out_ref, *, max_idx: int):
    idx = jnp.clip(t_ref[...], 0, max_idx)                          # (1, L) i32
    _lookup_body(idx, table_ref, out_ref)


# ----------------------------------------------------------------------------
# Module analog: caches the padded lookup tables at construction time.
# ----------------------------------------------------------------------------
class PredefinedNoiseScheduleDiscrete:
    GRIDLESS_MAX_B = 8192   # single gridless call up to this many lookups
    LANE_TILE = 8192        # lane-axis tile for the (rare) huge-B grid path

    def __init__(self, noise_schedule, timesteps, beta_start=None, beta_end=None):
        self.timesteps = int(timesteps)
        if noise_schedule == "cosine":
            betas_np = cosine_beta_schedule_discrete(timesteps)
        else:
            # TODO(synk): 'sigmoid' schedule not ported (needs
            # diffusion_utils.sigmoid_beta_schedule_discrete); only 'cosine'.
            raise NotImplementedError(noise_schedule)

        self._n = betas_np.shape[0]                      # timesteps + 1
        self._n_pad = ((self._n + 7) // 8) * 8           # sublane-pad the table

        # Buffers (match the PyTorch constructor; computed once in numpy/f32).
        betas_f32 = betas_np.astype(np.float32)
        self.betas = jnp.asarray(betas_f32)
        alphas_f32 = (1.0 - np.clip(betas_f32, 0.0, 0.9999)).astype(np.float32)
        self.alphas = jnp.asarray(alphas_f32)
        alphas_bar_f32 = np.exp(np.cumsum(np.log(alphas_f32),
                                          dtype=np.float32)).astype(np.float32)
        self.alphas_bar = jnp.asarray(alphas_bar_f32)

        # Sublane-padded table columns, cached ON DEVICE once.
        self._betas_col = self._pad_col(betas_f32)
        self._alphas_bar_col = self._pad_col(alphas_bar_f32)

    def _pad_col(self, table_np: np.ndarray) -> jnp.ndarray:
        col = np.zeros((self._n_pad, 1), np.float32)
        col[: self._n, 0] = table_np.astype(np.float32)
        return jnp.asarray(col)

    # -- core lookup -----------------------------------------------------
    def _lookup(self, table_col, t_normalized=None, t_int=None):
        assert int(t_normalized is None) + int(t_int is None) == 1
        max_idx = self._n - 1

        if t_int is not None:
            # Native integer path (torch does t_int.long(): truncation for floats).
            t = jnp.asarray(t_int).astype(jnp.int32)
            kernel = functools.partial(_gather_kernel_int, max_idx=max_idx)
        else:
            t = jnp.asarray(t_normalized, jnp.float32)
            kernel = functools.partial(_gather_kernel_float,
                                       scale=float(self.timesteps),
                                       max_idx=max_idx)

        orig_shape = t.shape
        row = t.reshape(1, -1)                 # lane-major: batch on lanes (free)
        b = row.shape[1]

        if b <= self.GRIDLESS_MAX_B:
            # Gridless: whole-array VMEM blocks, zero per-step grid overhead.
            out = pl.pallas_call(
                kernel,
                out_shape=jax.ShapeDtypeStruct((1, b), jnp.float32),
                in_specs=[
                    pl.BlockSpec(memory_space=pltpu.MemorySpace.VMEM),
                    pl.BlockSpec(memory_space=pltpu.MemorySpace.VMEM),
                ],
                out_specs=pl.BlockSpec(memory_space=pltpu.MemorySpace.VMEM),
            )(row, table_col)
            return out.reshape(orig_shape)

        # Huge-B path: tile the LANE axis; >=2 substantial steps so "parallel"
        # can shard across v7x's 2 TCs (neutral on v5e/v6e).
        tile = self.LANE_TILE
        b_pad = ((b + tile - 1) // tile) * tile
        if b_pad != b:
            row = jnp.pad(row, ((0, 0), (0, b_pad - b)))
        n_pad = self._n_pad
        out = pl.pallas_call(
            kernel,
            out_shape=jax.ShapeDtypeStruct((1, b_pad), jnp.float32),
            grid=(b_pad // tile,),
            in_specs=[
                pl.BlockSpec((1, tile), lambda i: (0, i)),
                # Constant block index -> table stays resident across steps.
                pl.BlockSpec((n_pad, 1), lambda i: (0, 0)),
            ],
            out_specs=pl.BlockSpec((1, tile), lambda i: (0, i)),
            compiler_params=pltpu.CompilerParams(
                dimension_semantics=("parallel",)),
        )(row, table_col)
        return out[0, :b].reshape(orig_shape)

    # -- public API (mirrors the PyTorch module) --------------------------
    def forward(self, t_normalized=None, t_int=None):
        return self._lookup(self._betas_col, t_normalized=t_normalized, t_int=t_int)

    __call__ = forward

    def get_alpha_bar(self, t_normalized=None, t_int=None):
        return self._lookup(self._alphas_bar_col,
                            t_normalized=t_normalized, t_int=t_int)


# ----------------------------------------------------------------------------
# Demo / self-check
# ----------------------------------------------------------------------------
if __name__ == "__main__":
    timesteps = 100                       # betas has length 101
    sched = PredefinedNoiseScheduleDiscrete("cosine", timesteps)
    betas_np = cosine_beta_schedule_discrete(timesteps).astype(np.float32)

    # Deterministic example input: t_normalized of shape (8, 1) in [0, 1].
    key = jax.random.PRNGKey(0)
    t_normalized = jax.random.uniform(key, (8, 1), dtype=jnp.float32)

    out = jax.block_until_ready(sched.forward(t_normalized=t_normalized))
    idx_ref = np.round(np.asarray(t_normalized) * timesteps).astype(np.int64)
    ref = betas_np[idx_ref]
    np.testing.assert_allclose(np.asarray(out), ref, rtol=1e-6, atol=1e-6)

    # Native int32 t_int path.
    t_int = jnp.asarray([[0], [1], [50], [timesteps]], jnp.int32)
    out_int = jax.block_until_ready(sched.forward(t_int=t_int))
    ref_int = betas_np[np.asarray(t_int)]
    np.testing.assert_allclose(np.asarray(out_int), ref_int, rtol=1e-6, atol=1e-6)

    # get_alpha_bar check (same gather, different cached table column).
    out_ab = jax.block_until_ready(sched.get_alpha_bar(t_normalized=t_normalized))
    ref_ab = np.asarray(sched.alphas_bar)[idx_ref]
    np.testing.assert_allclose(np.asarray(out_ab), ref_ab, rtol=1e-6, atol=1e-6)

    # Exercise the lane-tiled grid path (B > GRIDLESS_MAX_B, still tiny data).
    key2 = jax.random.PRNGKey(1)
    t_big = jax.random.uniform(key2, (8832,), dtype=jnp.float32)
    out_big = jax.block_until_ready(sched.forward(t_normalized=t_big))
    ref_big = betas_np[np.round(np.asarray(t_big) * timesteps).astype(np.int64)]
    np.testing.assert_allclose(np.asarray(out_big), ref_big, rtol=1e-6, atol=1e-6)

    print("KERNEL_OK")
</pallas_src>

<mosaic_0001>
module attributes {stable_mosaic.version = 11 : i64} {
  func.func @_gather_kernel_float(%arg0: memref<1x8xf32, #tpu.memory_space<vmem>>, %arg1: memref<104x1xf32, #tpu.memory_space<vmem>>, %arg2: memref<1x8xf32, #tpu.memory_space<vmem>>) attributes {dimension_semantics = [], scalar_prefetch = 0 : i64, scratch_operands = 0 : i64, tpu.core_type = #tpu.core_type<tc>} {
    %c0 = arith.constant 0 : index
    %c0_0 = arith.constant 0 : index
    %0 = vector.load %arg0[%c0, %c0_0] : memref<1x8xf32, #tpu.memory_space<vmem>>, vector<1x8xf32>
    %cst = arith.constant 1.000000e+02 : f32
    %1 = vector.broadcast %cst : f32 to vector<1x8xf32>
    %2 = arith.mulf %0, %1 : vector<1x8xf32>
    %3 = math.roundeven %2 : vector<1x8xf32>
    %4 = arith.fptosi %3 : vector<1x8xf32> to vector<1x8xi32>
    %c0_i32 = arith.constant 0 : i32
    %c100_i32 = arith.constant 100 : i32
    %5 = vector.broadcast %c0_i32 : i32 to vector<1x8xi32>
    %6 = arith.maxsi %5, %4 : vector<1x8xi32>
    %7 = vector.broadcast %c100_i32 : i32 to vector<1x8xi32>
    %8 = arith.minsi %7, %6 : vector<1x8xi32>
    %9 = tpu.iota {dimensions = array<i32: 0>} : vector<104x8xi32>
    %10 = vector.broadcast %8 : vector<1x8xi32> to vector<104x8xi32>
    %11 = arith.cmpi eq, %9, %10 : vector<104x8xi32>
    %c0_1 = arith.constant 0 : index
    %c0_2 = arith.constant 0 : index
    %12 = vector.load %arg1[%c0_1, %c0_2] : memref<104x1xf32, #tpu.memory_space<vmem>>, vector<104x1xf32>
    %cst_3 = arith.constant 0.000000e+00 : f32
    %13 = vector.shape_cast %12 : vector<104x1xf32> to vector<104x1xf32>
    %14 = vector.broadcast %13 : vector<104x1xf32> to vector<104x8xf32>
    %15 = vector.broadcast %cst_3 : f32 to vector<104x8xf32>
    %16 = arith.select %11, %14, %15 : vector<104x8xi1>, vector<104x8xf32>
    %cst_4 = arith.constant dense<0.000000e+00> : vector<8xf32>
    %17 = vector.multi_reduction <add>, %16, %cst_4 [0] : vector<104x8xf32> to vector<8xf32>
    %18 = vector.shape_cast %17 : vector<8xf32> to vector<1x8xf32>
    %c0_5 = arith.constant 0 : index
    %c0_6 = arith.constant 0 : index
    %19 = vector.load %arg2[%c0_5, %c0_6] : memref<1x8xf32, #tpu.memory_space<vmem>>, vector<1x8xf32>
    tpu.vector_store %arg2[%c0_5, %c0_6], %18 {strides = array<i32>} : memref<1x8xf32, #tpu.memory_space<vmem>>, vector<1x8xf32>,
    return
  }
}

</mosaic_0001>

<bundles_post_ra>
// kernel: tpu_custom_call.1
= control target key start
LH: loop header
LB: loop body
LE: loop exit
PB: predicated region body
PF: predicated region fallthrough
CT: control target
= control target key end

     0   :  { %v218_v2 = vmov 0   ;;  %s308_s0 = inlined_call_operand.vmem [shape: f32[1,8], index: 0, kind: input, shape index: {}]   ;;  %s309_s1 = inlined_call_operand.vmem [shape: f32[104,1], index: 1, kind: input, shape index: {}]   ;;  %s310_s2 = inlined_call_operand.hbm [shape: f32[1,8], index: 2, kind: output, shape index: {}]  }
   0x1   :  { %v52_v0 = vld [vmem:[%s309_s1 + $0x10] sm:$0xff]  ;;  %v50_v1 = vld [vmem:[%s309_s1] sm:$0xff]  ;;  %195 = vset.pattern.permute.xlu1 %v218_v2  ;;  %194 = vset.pattern.permute.xlu0 %v218_v2  ;;  %v53_v3 = vld [vmem:[%s309_s1 + $0x18] sm:$0xff] }
   0x2   :  { %75 = vperm.xlu1 %195, %v52_v0   ;;  %65 = vperm.xlu0 %194, %v50_v1   ;;  %v51_v4 = vld [vmem:[%s309_s1 + $0x8] sm:$0xff] }
   0x3   :  { %7 = vsyncpa [#allocation3], 0  ;;  %v55_v5 = vld [vmem:[%s309_s1 + $0x28] sm:$0xff]  ;;  %v54_v6 = vld [vmem:[%s309_s1 + $0x20] sm:$0xff]  ;;  %v19_v17 = vlaneseq  ;;  %vm141_vm5 = vcmask 64512  }
   0x4   :  { %v57_v7 = vld [vmem:[%s309_s1 + $0x38] sm:$0xff]  ;;  %v56_v8 = vld [vmem:[%s309_s1 + $0x30] sm:$0xff]  ;;  %v59_v9 = vld [vmem:[%s309_s1 + $0x48] sm:$0xff] }
   0x5   :  { %v58_v10 = vld [vmem:[%s309_s1 + $0x40] sm:$0xff]  ;;  %v61_v11 = vld [vmem:[%s309_s1 + $0x58] sm:$0xff]  ;;  %v60_v12 = vld [vmem:[%s309_s1 + $0x50] sm:$0xff]  ;;  %v20_v19 = vshrl.u32 %v19_v17, 7 }
   0x6   :  { %80 = vperm.xlu1 %195, %v53_v3   ;;  %70 = vperm.xlu0 %194, %v51_v4   ;;  %v62_v13 = vld [vmem:[%s309_s1 + $0x60] sm:$0xff] }
   0x7   :  { %v12_v14 = vld [vmem:[%s308_s0] sm:$0x1]  ;;  %v35_v20 = vsub.s32 0, %v20_v19  ;;  %v22_v23 = vadd.s32 16, %v20_v19  ;;  %v21_v24 = vadd.s32 8, %v20_v19  ;;  %v23_v27 = vadd.s32 24, %v20_v19 }
   0x8   :  { %v13_v15 = vmul.f32 100.0, %v12_v14  ;;  %v24_v28 = vadd.s32 32, %v20_v19  ;;  %v25_v32 = vadd.s32 40, %v20_v19  ;;  %v26_v37 = vadd.s32 48, %v20_v19  ;;  %s219_s0 = smov [#allocation2]  }
   0x9   :  { %v27_v43 = vadd.s32 56, %v20_v19  ;;  %v28_v47 = vadd.s32 64, %v20_v19  ;;  %v29_v53 = vadd.s32 72, %v20_v19  ;;  %v30_v57 = vadd.s32 80, %v20_v19  ;;  %s181_s1 = sshll.u32 %s219_s0, 4  ;;  %s182_s1 = int_to_ptr.vmem [resolvable:$true] %s181_s1 }
   0xa   :  { %90 = vperm.xlu1 %195, %v55_v5   ;;  %85 = vperm.xlu0 %194, %v54_v6   ;;  %v191_v16 = vcvt.f32.s32 %v13_v15  ;;  %v31_v63 = vadd.s32 88, %v20_v19  ;;  %v32_v3 = vadd.s32 96, %v20_v19  ;;  %s196_s9 = scalar_lea.vmem %s182_s1, 16  ;;  %s200_s10 = scalar_lea.vmem %s182_s1, 32 }
   0xb   :  { %p197_p0 = scmp.ne.s32.totalorder %s182_s1, %s196_s9  ;;  %p201_p1 = scmp.lt.s32.totalorder %s182_s1, %s182_s1 }
   0xc   :  { %vm15_vm0 = vcmp.gt.s32.totalorder %v191_v16, 0  ;;  %p202_p2 = scmp.lt.s32.totalorder %s200_s10, %s196_s9 }
   0xd   :  { %v16_v18 = vsel %vm15_vm0, %v191_v16, 0  ;;  %vm173_vm0 = vcmask 57344  }
   0xe   :  { %100 = vperm.xlu1 %195, %v57_v7   ;;  %95 = vperm.xlu0 %194, %v56_v8   ;;  %vm17_vm1 = vcmp.lt.s32.totalorder %v16_v18, 100  ;;  %p203_p3 = por %p202_p2, %p201_p1 }
   0xf   :  { %v18_v21 = vsel %vm17_vm1, %v16_v18, 100 }
  0x10   :  { %v277_v22 = vrot.slane %v18_v21, %v35_v20  ;;  %p204_p4 = pnand %p203_p3, %p197_p0 }
  0x12   :  { %110 = vperm.xlu1 %195, %v59_v9   ;;  %105 = vperm.xlu0 %194, %v58_v10   ;;  %vm37_vm2 = vcmp.eq.s32.totalorder %v20_v19, %v277_v22  ;;  %vm39_vm3 = vcmp.eq.s32.totalorder %v22_v23, %v277_v22  ;;  %vm38_vm4 = vcmp.eq.s32.totalorder %v21_v24, %v277_v22 }
  0x13   :  { %vm40_vm6 = vcmp.eq.s32.totalorder %v23_v27, %v277_v22  ;;  %vm41_vm7 = vcmp.eq.s32.totalorder %v24_v28, %v277_v22  ;;  %vm42_vm8 = vcmp.eq.s32.totalorder %v25_v32, %v277_v22  ;;  %vm43_vm9 = vcmp.eq.s32.totalorder %v26_v37, %v277_v22 }
  0x14   :  { %vm44_vm10 = vcmp.eq.s32.totalorder %v27_v43, %v277_v22  ;;  %vm45_vm11 = vcmp.eq.s32.totalorder %v28_v47, %v277_v22  ;;  %vm46_vm12 = vcmp.eq.s32.totalorder %v29_v53, %v277_v22  ;;  %vm47_vm13 = vcmp.eq.s32.totalorder %v30_v57, %v277_v22 }
  0x15   :  { %vm48_vm14 = vcmp.eq.s32.totalorder %v31_v63, %v277_v22  ;;  %vm49_vm15 = vcmp.eq.s32.totalorder %v32_v3, %v277_v22 }
  0x16   :  { %120 = vperm.xlu1 %195, %v61_v11   ;;  %115 = vperm.xlu0 %194, %v60_v12  }
  0x1a   :  { %125 = vperm.xlu0 %194, %v62_v13  }
  0x7d   :  { %v76_v25 = vpop.permute.xlu1 %75  ;;  %v66_v26 = vpop.permute.xlu0 %65 }
  0x7e   :  { %v128_v29 = vsel %vm37_vm2, %v66_v26, 0.0  ;;  %v130_v33 = vsel %vm39_vm3, %v76_v25, 0.0 }
  0x7f   :  { %v142_v35 = vsel %vm141_vm5, %v128_v29, 0.0  ;;  %v145_v40 = vsel %vm141_vm5, %v130_v33, 0.0 }
  0x81   :  { %v81_v30 = vpop.permute.xlu1 %80  ;;  %v71_v31 = vpop.permute.xlu0 %70 }
  0x82   :  { %v129_v34 = vsel %vm38_vm4, %v71_v31, 0.0  ;;  %v131_v38 = vsel %vm40_vm6, %v81_v30, 0.0 }
  0x83   :  { %v143_v36 = vsel %vm141_vm5, %v129_v34, 0.0  ;;  %v147_v46 = vsel %vm141_vm5, %v131_v38, 0.0 }
  0x84   :  { %v144_v39 = vadd.f32 %v143_v36, %v142_v35 }
  0x85   :  { %v91_v41 = vpop.permute.xlu1 %90  ;;  %v86_v42 = vpop.permute.xlu0 %85 }
  0x86   :  { %v146_v44 = vadd.f32 %v145_v40, %v144_v39  ;;  %v132_v45 = vsel %vm41_vm7, %v86_v42, 0.0  ;;  %v133_v48 = vsel %vm42_vm8, %v91_v41, 0.0 }
  0x87   :  { %v149_v50 = vsel %vm141_vm5, %v132_v45, 0.0  ;;  %v151_v56 = vsel %vm141_vm5, %v133_v48, 0.0 }
  0x88   :  { %v148_v49 = vadd.f32 %v147_v46, %v146_v44 }
  0x89   :  { %v101_v51 = vpop.permute.xlu1 %100  ;;  %v96_v52 = vpop.permute.xlu0 %95 }
  0x8a   :  { %v150_v54 = vadd.f32 %v149_v50, %v148_v49  ;;  %v134_v55 = vsel %vm43_vm9, %v96_v52, 0.0  ;;  %v135_v58 = vsel %vm44_vm10, %v101_v51, 0.0 }
  0x8b   :  { %v153_v60 = vsel %vm141_vm5, %v134_v55, 0.0  ;;  %v155_v2 = vsel %vm141_vm5, %v135_v58, 0.0 }
  0x8c   :  { %v152_v59 = vadd.f32 %v151_v56, %v150_v54 }
  0x8d   :  { %v111_v61 = vpop.permute.xlu1 %110  ;;  %v106_v62 = vpop.permute.xlu0 %105 }
  0x8e   :  { %v154_v0 = vadd.f32 %v153_v60, %v152_v59  ;;  %v136_v1 = vsel %vm45_vm11, %v106_v62, 0.0  ;;  %v137_v4 = vsel %vm46_vm12, %v111_v61, 0.0 }
  0x8f   :  { %v157_v6 = vsel %vm141_vm5, %v136_v1, 0.0  ;;  %v159_v11 = vsel %vm141_vm5, %v137_v4, 0.0 }
  0x90   :  { %v156_v5 = vadd.f32 %v155_v2, %v154_v0 }
  0x91   :  { %v121_v7 = vpop.permute.xlu1 %120  ;;  %v116_v8 = vpop.permute.xlu0 %115 }
  0x92   :  { %v158_v9 = vadd.f32 %v157_v6, %v156_v5  ;;  %v138_v10 = vsel %vm47_vm13, %v116_v8, 0.0  ;;  %v139_v12 = vsel %vm48_vm14, %v121_v7, 0.0 }
  0x93   :  { %v161_v14 = vsel %vm141_vm5, %v138_v10, 0.0  ;;  %v163_v18 = vsel %vm141_vm5, %v139_v12, 0.0 }
  0x94   :  { %v160_v13 = vadd.f32 %v159_v11, %v158_v9 }
  0x95   :  { %v126_v15 = vpop.permute.xlu0 %125 }
  0x96   :  { %v162_v16 = vadd.f32 %v161_v14, %v160_v13  ;;  %v140_v17 = vsel %vm49_vm15, %v126_v15, 0.0 }
  0x97   :  { %v165_v20 = vsel %vm141_vm5, %v140_v17, 0.0 }
  0x98   :  { %v164_v19 = vadd.f32 %v163_v18, %v162_v16 }
  0x9a   :  { %v166_v21 = vadd.f32 %v165_v20, %v164_v19 }
  0x9c   :  { %v167_v23 = vrot.slane %v166_v21, 4 }
  0x9e   :  { %v168_v24 = vadd.f32 %v167_v23, %v166_v21 }
  0xa0   :  { %v169_v25 = vrot.slane %v168_v24, 2 }
  0xa2   :  { %v170_v26 = vadd.f32 %v169_v25, %v168_v24 }
  0xa4   :  { %v171_v22 = vrot.slane %v170_v26, 1 }
  0xa6   :  { %v172_v27 = vadd.f32 %v171_v22, %v170_v26 }
  0xa8   :  { %174 = vst.msk [vmem:[#allocation2] sm:$0x1] %vm173_vm0, %v172_v27 }
  0xa9   :  { %207 = shalt.err (!%p204_p4)
}
  0xaa   :  { %184 = dma.vmem_to_hbm [thread:$0]  %s182_s1, 16, %s310_s2, [#allocation3]  }
  0xab   :  { %216 = dma.done.wait [#allocation3], 16  }
  0xac   :  { %217 = vsyncadd [#allocation3], 4294967280 }
  0xad   :  { %188 = vsyncpa [#allocation3], 1 }

</bundles_post_ra>
